<compile_context>
chip_gen: v6e
topology: v6e:2x2x1
jax: 0.10.0
libtpu: 0.0.40
codegen_flags: <defaults>
</compile_context>

<pallas_src>
import functools

import jax
import jax.numpy as jnp
from jax import lax
from jax.experimental import pallas as pl
from jax.experimental.pallas import tpu as pltpu

LANES = 128
BCE_WEIGHT = 0.5


def _chip_config():
    """Returns (ncores, tm_max, vmem_limit_bytes) tuned per TPU generation."""
    try:
        kind = jax.devices()[0].device_kind.lower()
    except Exception:  # defensive: never let device sniffing break the kernel
        kind = ""
    if "v7" in kind:
        # 2 TensorCores/chip, but only 64 MiB physical VMEM -> modest tiles.
        return 2, 2048, None
    if "v5p" in kind or "v4" in kind:
        # Megacore chips: 2 TCs per device, large VMEM.
        return 2, 2048, None
    if "v6" in kind or "v5e" in kind or "v5 lite" in kind:
        # Single TC, 128 MiB VMEM: larger tiles amortize per-step overhead.
        return 1, 4096, 96 * 1024 * 1024
    return 1, 2048, None


def _dice_bce_partials_kernel(x_ref, t_ref, o_ref,
                              acc_inter, acc_sxt, acc_nbce,
                              *, m_rows, tm, tiles_per_core, total_tiles,
                              need_mask, binary_targets):
    c = pl.program_id(0)   # TensorCore split (parallel)
    i = pl.program_id(1)   # row-tile reduction axis (arbitrary)

    @pl.when(i == 0)
    def _init():
        acc_inter[...] = jnp.zeros_like(acc_inter)
        acc_sxt[...] = jnp.zeros_like(acc_sxt)
        acc_nbce[...] = jnp.zeros_like(acc_nbce)

    def _acc(acc_ref, v):
        # Reduce the (tm,128) tile only down to (8,128): pure VPU vreg adds,
        # no per-step cross-sublane XLU reduce and no masked (1,128) stores.
        if tm % 8 == 0:
            acc_ref[...] += v.reshape(tm // 8, 8, LANES).sum(axis=0)
        else:  # tiny single-tile fallback (whole array fits in one block)
            acc_ref[0:1, :] += jnp.sum(v, axis=0, keepdims=True)

    def _accumulate(mask_rows):
        xb = x_ref[...].astype(jnp.float32)
        tb = t_ref[...].astype(jnp.float32)
        if mask_rows:
            # Zero rows beyond the real row count (overhang / clamped dup).
            row = lax.broadcasted_iota(jnp.int32, xb.shape, 0)
            global_row = (c * tiles_per_core + i) * tm + row
            valid = global_row < m_rows
            xb = jnp.where(valid, xb, 0.0)
            tb = jnp.where(valid, tb, 0.0)
        # Negative per-element BCE (negation deferred to wrapper):
        #   nbce = t*log(x) + (1-t)*log(1-x), logs clamped at -100 (PyTorch).
        # Factored to save VPU ops. Masked elements (x=0,t=0) contribute 0.
        if binary_targets:
            p = jnp.where(tb >= 0.5, xb, 1.0 - xb)
            nbce = jnp.maximum(jnp.log(p), -100.0)
        else:
            log_x = jnp.maximum(jnp.log(xb), -100.0)
            log_1mx = jnp.maximum(jnp.log(1.0 - xb), -100.0)
            nbce = tb * (log_x - log_1mx) + log_1mx
        _acc(acc_inter, xb * tb)
        _acc(acc_sxt, xb + tb)
        _acc(acc_nbce, nbce)

    if need_mask:
        # Only the last (overhanging) and clamped-duplicate tiles pay the mask.
        is_edge = (c * tiles_per_core + i) >= (total_tiles - 1)

        @pl.when(jnp.logical_not(is_edge))
        def _plain():
            _accumulate(mask_rows=False)

        @pl.when(is_edge)
        def _masked():
            _accumulate(mask_rows=True)
    else:
        _accumulate(mask_rows=False)

    @pl.when(i == pl.num_programs(1) - 1)
    def _finalize():
        o_ref[0, 0, :, :] = acc_inter[...]
        o_ref[0, 1, :, :] = acc_sxt[...]
        o_ref[0, 2, :, :] = acc_nbce[...]


def _run_partials(x2, t2, m_rows, ncores, tm_max, vmem_limit, binary_targets):
    tm = m_rows if m_rows <= tm_max else tm_max
    total_tiles = pl.cdiv(m_rows, tm)
    if total_tiles <= 1:
        ncores = 1            # no point splitting a single tile
    tiles_per_core = pl.cdiv(total_tiles, ncores)
    need_mask = (ncores * tiles_per_core * tm) != m_rows

    def idx_map(c, i):
        # Clamp possibly-overhanging tiles onto a valid block; their
        # contribution is zeroed by the in-kernel row mask.
        return (jnp.minimum(c * tiles_per_core + i, total_tiles - 1), 0)

    kernel = functools.partial(
        _dice_bce_partials_kernel,
        m_rows=m_rows, tm=tm, tiles_per_core=tiles_per_core,
        total_tiles=total_tiles, need_mask=need_mask,
        binary_targets=binary_targets)

    cp_kwargs = dict(dimension_semantics=("parallel", "arbitrary"))
    if vmem_limit is not None:
        cp_kwargs["vmem_limit_bytes"] = vmem_limit

    return pl.pallas_call(
        kernel,
        out_shape=jax.ShapeDtypeStruct((ncores, 3, 8, LANES), jnp.float32),
        grid_spec=pltpu.PrefetchScalarGridSpec(
            num_scalar_prefetch=0,
            grid=(ncores, tiles_per_core),
            in_specs=[
                pl.BlockSpec((tm, LANES), idx_map),
                pl.BlockSpec((tm, LANES), idx_map),
            ],
            out_specs=pl.BlockSpec((1, 3, 8, LANES), lambda c, i: (c, 0, 0, 0)),
            scratch_shapes=[pltpu.VMEM((8, LANES), jnp.float32)] * 3,
        ),
        compiler_params=pltpu.CompilerParams(**cp_kwargs),
    )(x2, t2)


def dice_bce_loss(inputs, targets, smooth=1.0, binary_targets=False):
    """Pallas TPU implementation of DiceBCELoss.forward."""
    n = inputs.size
    x = jnp.ravel(inputs)
    t = jnp.ravel(targets)

    rem = n % LANES
    n_main = n - rem

    # <128-element lane tail handled in plain JAX (no full-array pad copy).
    zero = jnp.float32(0.0)
    tail_inter = tail_sxt = tail_nbce = zero
    if rem:
        xt = x[n_main:].astype(jnp.float32)
        tt = t[n_main:].astype(jnp.float32)
        tail_inter = jnp.sum(xt * tt)
        tail_sxt = jnp.sum(xt + tt)
        log_x = jnp.maximum(jnp.log(xt), -100.0)
        log_1mx = jnp.maximum(jnp.log(1.0 - xt), -100.0)
        tail_nbce = jnp.sum(tt * (log_x - log_1mx) + log_1mx)

    if n_main:
        ncores, tm_max, vmem_limit = _chip_config()
        # Aligned case: ravel/reshape are free (no copy). When rem != 0 the
        # prefix slice may materialize; tail itself is never padded/copied.
        x2 = x[:n_main].reshape(n_main // LANES, LANES)
        t2 = t[:n_main].reshape(n_main // LANES, LANES)
        partials = _run_partials(x2, t2, n_main // LANES, ncores, tm_max,
                                 vmem_limit, binary_targets)
        # Single cross-core / cross-sublane / cross-lane reduce (tiny).
        sums = jnp.sum(partials, axis=(0, 2, 3))   # [inter, sum_x+sum_t, nbce]
        inter = sums[0] + tail_inter
        sxt = sums[1] + tail_sxt
        nbce_sum = sums[2] + tail_nbce
    else:
        inter, sxt, nbce_sum = tail_inter, tail_sxt, tail_nbce

    bce_mean = -nbce_sum / n
    dice_loss = 1.0 - (2.0 * inter + smooth) / (sxt + smooth)
    return BCE_WEIGHT * bce_mean + (1.0 - BCE_WEIGHT) * dice_loss


if __name__ == "__main__":
    key = jax.random.PRNGKey(0)
    k1, k2 = jax.random.split(key)
    shape = (2, 4, 16, 16)  # (B, C, H, W) segmentation-style input
    x = jax.nn.sigmoid(jax.random.normal(k1, shape, dtype=jnp.float32))
    t = (jax.random.uniform(k2, shape) > 0.5).astype(jnp.float32)

    loss = dice_bce_loss(x, t, smooth=1.0)
    jax.block_until_ready(loss)

    # Plain-JAX reference of the PyTorch forward.
    xi = x.reshape(-1).astype(jnp.float32)
    ti = t.reshape(-1).astype(jnp.float32)
    inter = jnp.sum(xi * ti)
    dice_loss_ref = 1.0 - (2.0 * inter + 1.0) / (jnp.sum(xi) + jnp.sum(ti) + 1.0)
    log_x = jnp.maximum(jnp.log(xi), -100.0)
    log_1mx = jnp.maximum(jnp.log(1.0 - xi), -100.0)
    bce_ref = jnp.mean(-(ti * log_x + (1.0 - ti) * log_1mx))
    ref = 0.5 * bce_ref + 0.5 * dice_loss_ref

    assert jnp.allclose(loss, ref, rtol=2e-5, atol=2e-5), (loss, ref)
    print("KERNEL_OK")
</pallas_src>

<mosaic_0001>
module attributes {stable_mosaic.version = 11 : i64} {
  func.func @_dice_bce_partials_kernel(%arg0: i32, %arg1: i32, %arg2: memref<16x128xf32, #tpu.memory_space<vmem>>, %arg3: memref<16x128xf32, #tpu.memory_space<vmem>>, %arg4: memref<1x3x8x128xf32, #tpu.memory_space<vmem>>, %arg5: memref<8x128xf32, #tpu.memory_space<vmem>>, %arg6: memref<8x128xf32, #tpu.memory_space<vmem>>, %arg7: memref<8x128xf32, #tpu.memory_space<vmem>>) attributes {dimension_semantics = [#tpu.dimension_semantics<parallel>, #tpu.dimension_semantics<arbitrary>], iteration_bounds = array<i64: 1, 1>, scalar_prefetch = 0 : i64, scratch_operands = 3 : i64, tpu.core_type = #tpu.core_type<tc>, window_params = [{transform_indices = @transform_0, window_bounds = array<i64: 16, 128>}, {transform_indices = @transform_1, window_bounds = array<i64: 16, 128>}, {transform_indices = @transform_2, window_bounds = array<i64: 1, 3, 8, 128>}]} {
    %c0_i32 = arith.constant 0 : i32
    %0 = arith.cmpi eq, %arg1, %c0_i32 : i32
    %1 = arith.extui %0 : i1 to i32
    %c0_i32_0 = arith.constant 0 : i32
    %2 = arith.cmpi ne, %1, %c0_i32_0 : i32
    scf.if %2 {
      %cst_23 = arith.constant 0.000000e+00 : f32
      %36 = vector.broadcast %cst_23 : f32 to vector<8x128xf32>
      %c0_24 = arith.constant 0 : index
      %c0_25 = arith.constant 0 : index
      %37 = vector.load %arg5[%c0_24, %c0_25] : memref<8x128xf32, #tpu.memory_space<vmem>>, vector<8x128xf32>
      tpu.vector_store %arg5[%c0_24, %c0_25], %36 {strides = array<i32>} : memref<8x128xf32, #tpu.memory_space<vmem>>, vector<8x128xf32>,
      %cst_26 = arith.constant 0.000000e+00 : f32
      %38 = vector.broadcast %cst_26 : f32 to vector<8x128xf32>
      %c0_27 = arith.constant 0 : index
      %c0_28 = arith.constant 0 : index
      %39 = vector.load %arg6[%c0_27, %c0_28] : memref<8x128xf32, #tpu.memory_space<vmem>>, vector<8x128xf32>
      tpu.vector_store %arg6[%c0_27, %c0_28], %38 {strides = array<i32>} : memref<8x128xf32, #tpu.memory_space<vmem>>, vector<8x128xf32>,
      %cst_29 = arith.constant 0.000000e+00 : f32
      %40 = vector.broadcast %cst_29 : f32 to vector<8x128xf32>
      %c0_30 = arith.constant 0 : index
      %c0_31 = arith.constant 0 : index
      %41 = vector.load %arg7[%c0_30, %c0_31] : memref<8x128xf32, #tpu.memory_space<vmem>>, vector<8x128xf32>
      tpu.vector_store %arg7[%c0_30, %c0_31], %40 {strides = array<i32>} : memref<8x128xf32, #tpu.memory_space<vmem>>, vector<8x128xf32>,
    } else {
    }
    %c0 = arith.constant 0 : index
    %c0_1 = arith.constant 0 : index
    %3 = vector.load %arg2[%c0, %c0_1] : memref<16x128xf32, #tpu.memory_space<vmem>>, vector<16x128xf32>
    %c0_2 = arith.constant 0 : index
    %c0_3 = arith.constant 0 : index
    %4 = vector.load %arg3[%c0_2, %c0_3] : memref<16x128xf32, #tpu.memory_space<vmem>>, vector<16x128xf32>
    %5 = math.log %3 : vector<16x128xf32>
    %cst = arith.constant -1.000000e+02 : f32
    %6 = vector.broadcast %cst : f32 to vector<16x128xf32>
    %7 = arith.maximumf %5, %6 : vector<16x128xf32>
    %cst_4 = arith.constant 1.000000e+00 : f32
    %8 = vector.broadcast %cst_4 : f32 to vector<16x128xf32>
    %9 = arith.subf %8, %3 : vector<16x128xf32>
    %10 = math.log %9 : vector<16x128xf32>
    %cst_5 = arith.constant -1.000000e+02 : f32
    %11 = vector.broadcast %cst_5 : f32 to vector<16x128xf32>
    %12 = arith.maximumf %10, %11 : vector<16x128xf32>
    %13 = arith.subf %7, %12 : vector<16x128xf32>
    %14 = arith.mulf %4, %13 : vector<16x128xf32>
    %15 = arith.addf %14, %12 : vector<16x128xf32>
    %16 = arith.mulf %3, %4 : vector<16x128xf32>
    %c0_6 = arith.constant 0 : index
    %c0_7 = arith.constant 0 : index
    %17 = vector.load %arg5[%c0_6, %c0_7] : memref<8x128xf32, #tpu.memory_space<vmem>>, vector<8x128xf32>
    %18 = vector.shape_cast %16 : vector<16x128xf32> to vector<2x8x128xf32>
    %cst_8 = arith.constant dense<0.000000e+00> : vector<8x128xf32>
    %19 = vector.multi_reduction <add>, %18, %cst_8 [0] : vector<2x8x128xf32> to vector<8x128xf32>
    %20 = arith.addf %17, %19 : vector<8x128xf32>
    %c0_9 = arith.constant 0 : index
    %c0_10 = arith.constant 0 : index
    %21 = vector.load %arg5[%c0_9, %c0_10] : memref<8x128xf32, #tpu.memory_space<vmem>>, vector<8x128xf32>
    tpu.vector_store %arg5[%c0_9, %c0_10], %20 {strides = array<i32>} : memref<8x128xf32, #tpu.memory_space<vmem>>, vector<8x128xf32>,
    %22 = arith.addf %3, %4 : vector<16x128xf32>
    %c0_11 = arith.constant 0 : index
    %c0_12 = arith.constant 0 : index
    %23 = vector.load %arg6[%c0_11, %c0_12] : memref<8x128xf32, #tpu.memory_space<vmem>>, vector<8x128xf32>
    %24 = vector.shape_cast %22 : vector<16x128xf32> to vector<2x8x128xf32>
    %cst_13 = arith.constant dense<0.000000e+00> : vector<8x128xf32>
    %25 = vector.multi_reduction <add>, %24, %cst_13 [0] : vector<2x8x128xf32> to vector<8x128xf32>
    %26 = arith.addf %23, %25 : vector<8x128xf32>
    %c0_14 = arith.constant 0 : index
    %c0_15 = arith.constant 0 : index
    %27 = vector.load %arg6[%c0_14, %c0_15] : memref<8x128xf32, #tpu.memory_space<vmem>>, vector<8x128xf32>
    tpu.vector_store %arg6[%c0_14, %c0_15], %26 {strides = array<i32>} : memref<8x128xf32, #tpu.memory_space<vmem>>, vector<8x128xf32>,
    %c0_16 = arith.constant 0 : index
    %c0_17 = arith.constant 0 : index
    %28 = vector.load %arg7[%c0_16, %c0_17] : memref<8x128xf32, #tpu.memory_space<vmem>>, vector<8x128xf32>
    %29 = vector.shape_cast %15 : vector<16x128xf32> to vector<2x8x128xf32>
    %cst_18 = arith.constant dense<0.000000e+00> : vector<8x128xf32>
    %30 = vector.multi_reduction <add>, %29, %cst_18 [0] : vector<2x8x128xf32> to vector<8x128xf32>
    %31 = arith.addf %28, %30 : vector<8x128xf32>
    %c0_19 = arith.constant 0 : index
    %c0_20 = arith.constant 0 : index
    %32 = vector.load %arg7[%c0_19, %c0_20] : memref<8x128xf32, #tpu.memory_space<vmem>>, vector<8x128xf32>
    tpu.vector_store %arg7[%c0_19, %c0_20], %31 {strides = array<i32>} : memref<8x128xf32, #tpu.memory_space<vmem>>, vector<8x128xf32>,
    %c0_i32_21 = arith.constant 0 : i32
    %33 = arith.cmpi eq, %arg1, %c0_i32_21 : i32
    %34 = arith.extui %33 : i1 to i32
    %c0_i32_22 = arith.constant 0 : i32
    %35 = arith.cmpi ne, %34, %c0_i32_22 : i32
    scf.if %35 {
      %c0_23 = arith.constant 0 : index
      %c0_24 = arith.constant 0 : index
      %36 = vector.load %arg5[%c0_23, %c0_24] : memref<8x128xf32, #tpu.memory_space<vmem>>, vector<8x128xf32>
      %c0_25 = arith.constant 0 : index
      %c0_26 = arith.constant 0 : index
      %c0_27 = arith.constant 0 : index
      %c0_28 = arith.constant 0 : index
      %37 = vector.load %arg4[%c0_25, %c0_26, %c0_27, %c0_28] : memref<1x3x8x128xf32, #tpu.memory_space<vmem>>, vector<1x1x8x128xf32>
      %38 = vector.shape_cast %37 : vector<1x1x8x128xf32> to vector<8x128xf32>
      %39 = vector.shape_cast %36 : vector<8x128xf32> to vector<1x1x8x128xf32>
      tpu.vector_store %arg4[%c0_25, %c0_26, %c0_27, %c0_28], %39 {strides = array<i32>} : memref<1x3x8x128xf32, #tpu.memory_space<vmem>>, vector<1x1x8x128xf32>,
      %c0_29 = arith.constant 0 : index
      %c0_30 = arith.constant 0 : index
      %40 = vector.load %arg6[%c0_29, %c0_30] : memref<8x128xf32, #tpu.memory_space<vmem>>, vector<8x128xf32>
      %c0_31 = arith.constant 0 : index
      %c1 = arith.constant 1 : index
      %c0_32 = arith.constant 0 : index
      %c0_33 = arith.constant 0 : index
      %41 = vector.load %arg4[%c0_31, %c1, %c0_32, %c0_33] : memref<1x3x8x128xf32, #tpu.memory_space<vmem>>, vector<1x1x8x128xf32>
      %42 = vector.shape_cast %41 : vector<1x1x8x128xf32> to vector<8x128xf32>
      %43 = vector.shape_cast %40 : vector<8x128xf32> to vector<1x1x8x128xf32>
      tpu.vector_store %arg4[%c0_31, %c1, %c0_32, %c0_33], %43 {strides = array<i32>} : memref<1x3x8x128xf32, #tpu.memory_space<vmem>>, vector<1x1x8x128xf32>,
      %c0_34 = arith.constant 0 : index
      %c0_35 = arith.constant 0 : index
      %44 = vector.load %arg7[%c0_34, %c0_35] : memref<8x128xf32, #tpu.memory_space<vmem>>, vector<8x128xf32>
      %c0_36 = arith.constant 0 : index
      %c2 = arith.constant 2 : index
      %c0_37 = arith.constant 0 : index
      %c0_38 = arith.constant 0 : index
      %45 = vector.load %arg4[%c0_36, %c2, %c0_37, %c0_38] : memref<1x3x8x128xf32, #tpu.memory_space<vmem>>, vector<1x1x8x128xf32>
      %46 = vector.shape_cast %45 : vector<1x1x8x128xf32> to vector<8x128xf32>
      %47 = vector.shape_cast %44 : vector<8x128xf32> to vector<1x1x8x128xf32>
      tpu.vector_store %arg4[%c0_36, %c2, %c0_37, %c0_38], %47 {strides = array<i32>} : memref<1x3x8x128xf32, #tpu.memory_space<vmem>>, vector<1x1x8x128xf32>,
    } else {
    }
    return
  }
  func.func @transform_0(%arg0: i32, %arg1: i32) -> (i32, i32) {
    %c1_i32 = arith.constant 1 : i32
    %0 = arith.muli %arg0, %c1_i32 : i32
    %1 = arith.addi %0, %arg1 : i32
    %c0_i32 = arith.constant 0 : i32
    %2 = arith.minsi %1, %c0_i32 : i32
    %c0_i32_0 = arith.constant 0 : i32
    %c0_i32_1 = arith.constant 0 : i32
    return %2, %c0_i32_0 : i32, i32
  }
  func.func @transform_1(%arg0: i32, %arg1: i32) -> (i32, i32) {
    %c1_i32 = arith.constant 1 : i32
    %0 = arith.muli %arg0, %c1_i32 : i32
    %1 = arith.addi %0, %arg1 : i32
    %c0_i32 = arith.constant 0 : i32
    %2 = arith.minsi %1, %c0_i32 : i32
    %c0_i32_0 = arith.constant 0 : i32
    %c0_i32_1 = arith.constant 0 : i32
    return %2, %c0_i32_0 : i32, i32
  }
  func.func @transform_2(%arg0: i32, %arg1: i32) -> (i32, i32, i32, i32) {
    %c0_i32 = arith.constant 0 : i32
    %c0_i32_0 = arith.constant 0 : i32
    %c0_i32_1 = arith.constant 0 : i32
    %c0_i32_2 = arith.constant 0 : i32
    return %arg0, %c0_i32, %c0_i32_0, %c0_i32_1 : i32, i32, i32, i32
  }
}

</mosaic_0001>

<bundles_post_ra>
// kernel: tpu_custom_call.1
= control target key start
LH: loop header
LB: loop body
LE: loop exit
PB: predicated region body
PF: predicated region fallthrough
CT: control target
= control target key end

     0   :  { %7 = vsyncpa [#allocation6], 0  ;;  %s257_s0 = inlined_call_operand.hbm [shape: f32[16,128], index: 0, kind: input, shape index: {}]   ;;  %s258_s1 = inlined_call_operand.hbm [shape: f32[16,128], index: 1, kind: input, shape index: {}]   ;;  %s259_s2 = inlined_call_operand.hbm [shape: f32[1,3,8,128], index: 2, kind: output, shape index: {}]  }
   0x1   :  { %8 = vsyncpa [#allocation9], 0 }
   0x2   :  { %9 = vsyncpa [#allocation7], 0  ;;  %s219_s9 = smov [#allocation5]  }
   0x3   :  { %s21_s10 = sshll.u32 %s219_s9, 4  ;;  %s22_s10 = int_to_ptr.vmem [resolvable:$true] %s21_s10 }
   0x4   :  { %s161_s11 = scalar_lea.vmem %s22_s10, 256  ;;  %p166_p1 = scmp.lt.s32.totalorder %s22_s10, %s22_s10 }
   0x5   :  { %p162_p0 = scmp.ne.s32.totalorder %s22_s10, %s161_s11  ;;  %p167_p2 = scmp.lt.s32.totalorder %s161_s11, %s161_s11 }
   0x7   :  { %p168_p3 = por %p167_p2, %p166_p1 }
   0x9   :  { %p169_p4 = pnand %p168_p3, %p162_p0 }
   0xb   :  { %172 = shalt.err (!%p169_p4)
}
   0xc   :  { %s220_s12 = smov 128   ;;  %s221_s13 = smov 8  }
   0xd   :  { %27 = dma.hbm_to_vmem [thread:$0]  %s257_s0, 256, %s22_s10, [#allocation6], %s220_s12, %s220_s12, %s221_s13  }
   0xe   :  { %s222_s16 = smov [#allocation8]  }
   0xf   :  { %s39_s17 = sshll.u32 %s222_s16, 4  ;;  %s40_s17 = int_to_ptr.vmem [resolvable:$true] %s39_s17 }
  0x10   :  { %s181_s18 = scalar_lea.vmem %s40_s17, 256  ;;  %p186_p6 = scmp.lt.s32.totalorder %s40_s17, %s40_s17 }
  0x11   :  { %p182_p5 = scmp.ne.s32.totalorder %s40_s17, %s181_s18  ;;  %p187_p7 = scmp.lt.s32.totalorder %s181_s18, %s181_s18 }
  0x13   :  { %p188_p8 = por %p187_p7, %p186_p6 }
  0x15   :  { %p189_p9 = pnand %p188_p8, %p182_p5 }
  0x17   :  { %192 = shalt.err (!%p189_p9)
}
  0x18   :  { %45 = dma.hbm_to_vmem [thread:$0]  %s258_s1, 256, %s40_s17, [#allocation9], %s220_s12, %s220_s12, %s221_s13  }
  0x19   :  { %213 = dma.done.wait [#allocation6], 256  }
  0x1a   :  { %214 = vsyncadd [#allocation6], 4294967040 }
  0x1b   :  { %215 = dma.done.wait [#allocation9], 256  }
  0x1c   :  { %216 = vsyncadd [#allocation9], 4294967040  ;;  %v67_v0 = vld [vmem:[#allocation5] sm:$0xff]  ;;  %v68_v1 = vld [vmem:[#allocation5 + $0x8] sm:$0xff]  ;;  %s223_s0 = smov [#allocation10]  }
  0x1d   :  { %v69_v2 = vld [vmem:[#allocation8] sm:$0xff]  ;;  %v70_v3 = vld [vmem:[#allocation8 + $0x8] sm:$0xff]  ;;  %145 = vlog2.f32 %v67_v0  ;;  %v77_v6 = vsub.f32 1.0, %v67_v0  ;;  %v78_v9 = vsub.f32 1.0, %v68_v1  ;;  %s123_s1 = sshll.u32 %s223_s0, 4  ;;  %s124_s1 = int_to_ptr.vmem [resolvable:$true] %s123_s1 }
  0x1e   :  { %v91_v4 = vmul.f32 %v69_v2, %v67_v0  ;;  %v97_v5 = vadd.f32 %v69_v2, %v67_v0  ;;  %147 = vlog2.f32 %v68_v1  ;;  %v92_v7 = vmul.f32 %v70_v3, %v68_v1  ;;  %s193_s21 = scalar_lea.vmem %s124_s1, 384  ;;  %p198_p11 = scmp.lt.s32.totalorder %s124_s1, %s124_s1 }
  0x1f   :  { %v98_v8 = vadd.f32 %v70_v3, %v68_v1  ;;  %149 = vlog2.f32 %v77_v6  ;;  %p194_p10 = scmp.ne.s32.totalorder %s124_s1, %s193_s21  ;;  %p199_p12 = scmp.lt.s32.totalorder %s193_s21, %s193_s21 }
  0x20   :  { %v94_v10 = vadd.f32 %v92_v7, %v91_v4  ;;  %151 = vlog2.f32 %v78_v9 }
  0x21   :  { %v100_v11 = vadd.f32 %v98_v8, %v97_v5  ;;  %p200_p13 = por %p199_p12, %p198_p11 }
  0x22   :  { %111 = vst [vmem:[#allocation10] sm:$0xff] %v94_v10 }
  0x23   :  { %114 = vst [vmem:[#allocation10 + $0x8] sm:$0xff] %v100_v11  ;;  %p201_p0 = pnand %p200_p13, %p194_p10 }
  0x2a   :  { %v146_v12 = vpop.eup %145 }
  0x2b   :  { %v148_v13 = vpop.eup %147  ;;  %v72_v14 = vmul.f32 0.6931472, %v146_v12 }
  0x2c   :  { %v150_v15 = vpop.eup %149  ;;  %v74_v16 = vmul.f32 0.6931472, %v148_v13 }
  0x2d   :  { %v152_v17 = vpop.eup %151  ;;  %v75_v18 = vmax.f32 %v72_v14, -100.0  ;;  %v80_v19 = vmul.f32 0.6931472, %v150_v15 }
  0x2e   :  { %v76_v20 = vmax.f32 %v74_v16, -100.0  ;;  %v82_v21 = vmul.f32 0.6931472, %v152_v17 }
  0x2f   :  { %v83_v22 = vmax.f32 %v80_v19, -100.0 }
  0x30   :  { %v84_v23 = vmax.f32 %v82_v21, -100.0 }
  0x31   :  { %v85_v24 = vsub.f32 %v75_v18, %v83_v22 }
  0x32   :  { %v86_v25 = vsub.f32 %v76_v20, %v84_v23 }
  0x33   :  { %v87_v26 = vmul.f32 %v85_v24, %v69_v2 }
  0x34   :  { %v88_v27 = vmul.f32 %v86_v25, %v70_v3 }
  0x35   :  { %v89_v28 = vadd.f32 %v87_v26, %v83_v22 }
  0x36   :  { %v90_v29 = vadd.f32 %v88_v27, %v84_v23 }
  0x38   :  { %v104_v30 = vadd.f32 %v90_v29, %v89_v28 }
  0x3a   :  { %117 = vst [vmem:[#allocation10 + $0x10] sm:$0xff] %v104_v30 }
  0x3b   :  { %204 = shalt.err (!%p201_p0)
}
  0x3c   :  { %129 = dma.vmem_to_hbm [thread:$0]  %s124_s1, 384, %s259_s2, [#allocation7], %s220_s12, %s220_s12, %s221_s13  }
  0x3d   :  { %217 = dma.done.wait [#allocation7], 384  }
  0x3e   :  { %218 = vsyncadd [#allocation7], 4294966912 }
  0x3f   :  { %133 = vsyncpa [#allocation6], 1 }
  0x40   :  { %134 = vsyncpa [#allocation9], 1 }
  0x41   :  { %135 = vsyncpa [#allocation7], 1 }

</bundles_post_ra>
